<compile_context>
chip_gen: v6e
topology: v6e:2x2x1
jax: 0.10.0
libtpu: 0.0.40
codegen_flags: <defaults>
</compile_context>

<pallas_src>
import functools

import jax
import jax.numpy as jnp
from jax import lax
from jax.experimental import pallas as pl
from jax.experimental.pallas import tpu as pltpu

_BN_EPS = 1e-5


def _linear_bn_kernel(x_ref, w_ref, g_ref, b_ref, o_ref, *, apply_relu):
    """Fused (x @ W) -> train-mode BatchNorm1d -> optional ReLU for one
    column tile of the output features.

    x_ref: (N, K) bf16  — resident across all output-column tiles
    w_ref: (K, T) bf16  — streamed weight column tile (pre-transposed to in*out)
    g_ref, b_ref: (1, T) f32 — BatchNorm affine (gamma, beta) for this tile
    o_ref: (N, T) bf16 (intermediate layers) or f32 (last layer)
    """
    x = x_ref[...]
    w = w_ref[...]
    # MXU matmul, f32 accumulation. Linear bias intentionally omitted: it is
    # exactly cancelled by BN's mean subtraction in training mode.
    h = jnp.dot(x, w, preferred_element_type=jnp.float32)

    # Train-mode BatchNorm1d over the batch axis (biased variance), single
    # pass over h: sum and sum-of-squares together, then fused scale/shift.
    inv_n = 1.0 / x_ref.shape[0]
    s1 = jnp.sum(h, axis=0, keepdims=True)          # XLU cross-sublane reduce
    s2 = jnp.sum(h * h, axis=0, keepdims=True)
    mean = s1 * inv_n
    var = jnp.maximum(s2 * inv_n - mean * mean, 0.0)   # guard fp cancellation
    inv_std = lax.rsqrt(var + _BN_EPS)                 # EUP slot

    scale = g_ref[...] * inv_std                       # (1, T)
    shift = b_ref[...] - mean * scale                  # (1, T)
    h = h * scale + shift                              # (N, T) VPU passes

    if apply_relu:
        h = jnp.maximum(h, 0.0)
    o_ref[...] = h.astype(o_ref.dtype)


def _pick_tile(out, tile_cols):
    """Largest 128-multiple divisor of `out` that is <= tile_cols; else `out`."""
    if out <= tile_cols:
        return out
    top = (tile_cols // 128) * 128
    for cand in range(top, 0, -128):
        if cand > 0 and out % cand == 0:
            return cand
    return out  # fall back to a single (untiled) column block


def _linear_bn(x, w, gamma, beta, *, relu, out_dtype, tile_cols=512,
               vmem_limit_bytes=32 * 1024 * 1024):
    """One fused Linear + BN (+ReLU) layer as a pallas_call.

    x: (N, K) (cast to bf16 for the MXU if needed), w: (K, OUT) bf16
    (pre-transposed), gamma/beta: (1, OUT) f32.  Grid streams OUT column tiles.
    """
    n, k = x.shape
    kw, out = w.shape
    assert k == kw
    tile = _pick_tile(out, tile_cols)
    grid = (out // tile,)

    x_bf16 = x if x.dtype == jnp.bfloat16 else x.astype(jnp.bfloat16)
    w_bf16 = w if w.dtype == jnp.bfloat16 else w.astype(jnp.bfloat16)

    return pl.pallas_call(
        functools.partial(_linear_bn_kernel, apply_relu=relu),
        out_shape=jax.ShapeDtypeStruct((n, out), out_dtype),
        grid_spec=pltpu.PrefetchScalarGridSpec(
            num_scalar_prefetch=0,
            grid=grid,
            in_specs=[
                pl.BlockSpec((n, k), lambda j: (0, 0)),      # activations: resident
                pl.BlockSpec((k, tile), lambda j: (0, j)),   # weight column tile (streamed)
                pl.BlockSpec((1, tile), lambda j: (0, j)),   # gamma tile
                pl.BlockSpec((1, tile), lambda j: (0, j)),   # beta tile
            ],
            out_specs=pl.BlockSpec((n, tile), lambda j: (0, j)),
        ),
        compiler_params=pltpu.CompilerParams(
            # Column tiles are fully independent -> shard across both TCs on v7x.
            dimension_semantics=("parallel",),
            vmem_limit_bytes=vmem_limit_bytes,
        ),
    )(x_bf16, w_bf16, gamma, beta)


def projection_mlp(x, params, *, tile_cols=512):
    """3-layer SimSiam projection MLP forward (training-mode BN).

    Biases b1..b3 are NOT passed to the kernels: a Linear bias followed by
    train-mode BatchNorm is cancelled exactly by the mean subtraction.
    Intermediate activations are produced directly in bf16 (next layer's
    MXU input dtype); the final layer output is f32.
    """
    h = _linear_bn(x, params["w1"], params["g1"], params["be1"],
                   relu=True, out_dtype=jnp.bfloat16, tile_cols=tile_cols)
    h = _linear_bn(h, params["w2"], params["g2"], params["be2"],
                   relu=True, out_dtype=jnp.bfloat16, tile_cols=tile_cols)
    return _linear_bn(h, params["w3"], params["g3"], params["be3"],
                      relu=False, out_dtype=jnp.float32, tile_cols=tile_cols)


def init_params(key, in_dim, hidden_dim, out_dim):
    """Deterministic synthetic init (PyTorch Linear-like uniform fan-in).

    Weights are stored pre-transposed to (in, out) and in bf16 (matmul dtype);
    biases / gamma / beta stay f32.  Biases are generated only for the
    reference check (the kernel drops them — BN cancels them exactly).
    """
    ks = jax.random.split(key, 12)

    def linear(kw, kb, fan_in, fan_out):
        bound = 1.0 / float(fan_in) ** 0.5
        w = jax.random.uniform(kw, (fan_in, fan_out), jnp.float32, -bound, bound)
        b = jax.random.uniform(kb, (1, fan_out), jnp.float32, -bound, bound)
        return w.astype(jnp.bfloat16), b

    def bn(kg, kb, dim):
        g = 1.0 + 0.1 * jax.random.normal(kg, (1, dim), jnp.float32)
        be = 0.1 * jax.random.normal(kb, (1, dim), jnp.float32)
        return g, be

    w1, b1 = linear(ks[0], ks[1], in_dim, hidden_dim)
    g1, be1 = bn(ks[2], ks[3], hidden_dim)
    w2, b2 = linear(ks[4], ks[5], hidden_dim, hidden_dim)
    g2, be2 = bn(ks[6], ks[7], hidden_dim)
    w3, b3 = linear(ks[8], ks[9], hidden_dim, out_dim)
    g3, be3 = bn(ks[10], ks[11], out_dim)   # bn3 = BatchNorm1d(hidden) == out here
    return dict(w1=w1, b1=b1, g1=g1, be1=be1,
                w2=w2, b2=b2, g2=g2, be2=be2,
                w3=w3, b3=b3, g3=g3, be3=be3)


# ------------------------- plain-JAX references -------------------------

def _bn_ref(h, gamma, beta):
    """Textbook train-mode BatchNorm1d (two-pass centered stats, biased var)."""
    mean = jnp.mean(h, axis=0, keepdims=True)
    var = jnp.mean(jnp.square(h - mean), axis=0, keepdims=True)
    return gamma * (h - mean) / jnp.sqrt(var + _BN_EPS) + beta


def _reference(x, p, matmul_dtype):
    """Full module semantics (with Linear biases), matmul inputs in given dtype."""
    def mm(a, w):
        return jnp.dot(a.astype(matmul_dtype), w.astype(matmul_dtype),
                       preferred_element_type=jnp.float32)
    h = mm(x, p["w1"]) + p["b1"]
    h = jnp.maximum(_bn_ref(h, p["g1"], p["be1"]), 0.0)
    h = mm(h, p["w2"]) + p["b2"]
    h = jnp.maximum(_bn_ref(h, p["g2"], p["be2"]), 0.0)
    h = mm(h, p["w3"]) + p["b3"]
    return _bn_ref(h, p["g3"], p["be3"])


if __name__ == "__main__":
    key = jax.random.PRNGKey(0)
    k_x, k_p = jax.random.split(key)

    # Small but lane-dense shapes: feature dims are multiples of 128 so vregs,
    # MXU tiles and output stores are unmasked.  tile_cols=128 exercises the
    # multi-tile (grid > 1) column-streaming path.
    N, IN_DIM, HIDDEN, OUT = 8, 128, 256, 256

    x = jax.random.normal(k_x, (N, IN_DIM), jnp.float32)
    params = init_params(k_p, IN_DIM, HIDDEN, OUT)

    y = jax.block_until_ready(projection_mlp(x, params, tile_cols=128))
    assert y.shape == (N, OUT)
    assert y.dtype == jnp.float32

    # Tight check: reference mirrors the kernel's bf16 matmul inputs but keeps
    # the Linear biases and the textbook two-pass BN formulation — validates
    # the bias-cancellation / fused one-pass BN / bf16 intermediate storage
    # against the module math.
    y_tight = _reference(x, params, jnp.bfloat16)
    assert jnp.allclose(y, y_tight, atol=2e-3, rtol=2e-3), \
        "mismatch vs bf16-matmul reference"

    # Loose check: full-precision f32 module semantics (bf16 matmuls are the
    # only deliberate approximation; BN re-normalization keeps the gap small).
    y_f32 = _reference(x, params, jnp.float32)
    assert jnp.allclose(y, y_f32, atol=1e-1, rtol=1e-1), \
        "mismatch vs f32 module reference"

    print("KERNEL_OK")
</pallas_src>

<mosaic_0001>
module attributes {stable_mosaic.version = 11 : i64} {
  func.func @_linear_bn_kernel(%arg0: i32, %arg1: memref<8x128xbf16, #tpu.memory_space<vmem>>, %arg2: memref<128x128xbf16, #tpu.memory_space<vmem>>, %arg3: memref<1x128xf32, #tpu.memory_space<vmem>>, %arg4: memref<1x128xf32, #tpu.memory_space<vmem>>, %arg5: memref<8x128xbf16, #tpu.memory_space<vmem>>) attributes {dimension_semantics = [#tpu.dimension_semantics<parallel>], iteration_bounds = array<i64: 2>, scalar_prefetch = 0 : i64, scratch_operands = 0 : i64, tpu.core_type = #tpu.core_type<tc>, window_params = [{pipeline_mode = #tpu.pipeline_mode<synchronous>, transform_indices = @transform_0, window_bounds = array<i64: 8, 128>}, {transform_indices = @transform_1, window_bounds = array<i64: 128, 128>}, {transform_indices = @transform_2, window_bounds = array<i64: 1, 128>}, {transform_indices = @transform_3, window_bounds = array<i64: 1, 128>}, {transform_indices = @transform_4, window_bounds = array<i64: 8, 128>}]} {
    %c0 = arith.constant 0 : index
    %c0_0 = arith.constant 0 : index
    %0 = vector.load %arg1[%c0, %c0_0] : memref<8x128xbf16, #tpu.memory_space<vmem>>, vector<8x128xbf16>
    %c0_1 = arith.constant 0 : index
    %c0_2 = arith.constant 0 : index
    %1 = vector.load %arg2[%c0_1, %c0_2] : memref<128x128xbf16, #tpu.memory_space<vmem>>, vector<128x128xbf16>
    %cst = arith.constant dense<0.000000e+00> : vector<8x128xf32>
    %2 = tpu.matmul %0, %1, %cst {dimension_numbers = #tpu.dot_dimension_numbers<[1], [0], [0], [1], [0, 0, 1, 1], [], []>} : vector<8x128xbf16>, vector<128x128xbf16>, vector<8x128xf32> -> vector<8x128xf32>
    %cst_3 = arith.constant dense<0.000000e+00> : vector<128xf32>
    %3 = vector.multi_reduction <add>, %2, %cst_3 [0] : vector<8x128xf32> to vector<128xf32>
    %4 = vector.shape_cast %3 : vector<128xf32> to vector<1x128xf32>
    %5 = arith.mulf %2, %2 : vector<8x128xf32>
    %cst_4 = arith.constant dense<0.000000e+00> : vector<128xf32>
    %6 = vector.multi_reduction <add>, %5, %cst_4 [0] : vector<8x128xf32> to vector<128xf32>
    %7 = vector.shape_cast %6 : vector<128xf32> to vector<1x128xf32>
    %cst_5 = arith.constant 1.250000e-01 : f32
    %8 = vector.broadcast %cst_5 : f32 to vector<1x128xf32>
    %9 = arith.mulf %4, %8 : vector<1x128xf32>
    %cst_6 = arith.constant 1.250000e-01 : f32
    %10 = vector.broadcast %cst_6 : f32 to vector<1x128xf32>
    %11 = arith.mulf %7, %10 : vector<1x128xf32>
    %12 = arith.mulf %9, %9 : vector<1x128xf32>
    %13 = arith.subf %11, %12 : vector<1x128xf32>
    %cst_7 = arith.constant 0.000000e+00 : f32
    %14 = vector.broadcast %cst_7 : f32 to vector<1x128xf32>
    %15 = arith.maximumf %13, %14 : vector<1x128xf32>
    %cst_8 = arith.constant 9.99999974E-6 : f32
    %16 = vector.broadcast %cst_8 : f32 to vector<1x128xf32>
    %17 = arith.addf %15, %16 : vector<1x128xf32>
    %18 = math.rsqrt %17 : vector<1x128xf32>
    %c0_9 = arith.constant 0 : index
    %c0_10 = arith.constant 0 : index
    %19 = vector.load %arg3[%c0_9, %c0_10] : memref<1x128xf32, #tpu.memory_space<vmem>>, vector<1x128xf32>
    %20 = arith.mulf %19, %18 : vector<1x128xf32>
    %c0_11 = arith.constant 0 : index
    %c0_12 = arith.constant 0 : index
    %21 = vector.load %arg4[%c0_11, %c0_12] : memref<1x128xf32, #tpu.memory_space<vmem>>, vector<1x128xf32>
    %22 = arith.mulf %9, %20 : vector<1x128xf32>
    %23 = arith.subf %21, %22 : vector<1x128xf32>
    %24 = vector.broadcast %20 : vector<1x128xf32> to vector<8x128xf32>
    %25 = arith.mulf %2, %24 : vector<8x128xf32>
    %26 = vector.broadcast %23 : vector<1x128xf32> to vector<8x128xf32>
    %27 = arith.addf %25, %26 : vector<8x128xf32>
    %cst_13 = arith.constant 0.000000e+00 : f32
    %28 = vector.broadcast %cst_13 : f32 to vector<8x128xf32>
    %29 = arith.maximumf %27, %28 : vector<8x128xf32>
    %30 = arith.truncf %29 : vector<8x128xf32> to vector<8x128xbf16>
    %c0_14 = arith.constant 0 : index
    %c0_15 = arith.constant 0 : index
    %31 = vector.load %arg5[%c0_14, %c0_15] : memref<8x128xbf16, #tpu.memory_space<vmem>>, vector<8x128xbf16>
    tpu.vector_store %arg5[%c0_14, %c0_15], %30 {strides = array<i32>} : memref<8x128xbf16, #tpu.memory_space<vmem>>, vector<8x128xbf16>,
    return
  }
  func.func @transform_0(%arg0: i32) -> (i32, i32) {
    %c0_i32 = arith.constant 0 : i32
    %c0_i32_0 = arith.constant 0 : i32
    %c0_i32_1 = arith.constant 0 : i32
    return %c0_i32, %c0_i32_0 : i32, i32
  }
  func.func @transform_1(%arg0: i32) -> (i32, i32) {
    %c0_i32 = arith.constant 0 : i32
    %c0_i32_0 = arith.constant 0 : i32
    return %c0_i32, %arg0 : i32, i32
  }
  func.func @transform_2(%arg0: i32) -> (i32, i32) {
    %c0_i32 = arith.constant 0 : i32
    %c0_i32_0 = arith.constant 0 : i32
    return %c0_i32, %arg0 : i32, i32
  }
  func.func @transform_3(%arg0: i32) -> (i32, i32) {
    %c0_i32 = arith.constant 0 : i32
    %c0_i32_0 = arith.constant 0 : i32
    return %c0_i32, %arg0 : i32, i32
  }
  func.func @transform_4(%arg0: i32) -> (i32, i32) {
    %c0_i32 = arith.constant 0 : i32
    %c0_i32_0 = arith.constant 0 : i32
    return %c0_i32, %arg0 : i32, i32
  }
}

</mosaic_0001>

<bundles_post_ra>
// kernel: tpu_custom_call.1
= control target key start
LH: loop header
LB: loop body
LE: loop exit
PB: predicated region body
PF: predicated region fallthrough
CT: control target
= control target key end

     0   :  { %9 = vsyncpa [#allocation3], 0  ;;  %s974_s0 = inlined_call_operand.hbm [shape: bf16[8,128], index: 0, kind: input, shape index: {}]   ;;  %s975_s1 = inlined_call_operand.hbm [shape: bf16[128,256], index: 1, kind: input, shape index: {}]   ;;  %s976_s2 = inlined_call_operand.vmem [shape: f32[1,256], index: 2, kind: input, shape index: {}]   ;;  %s977_s3 = inlined_call_operand.vmem [shape: f32[1,256], index: 3, kind: input, shape index: {}]   ;;  %s978_s4 = inlined_call_operand.hbm [shape: bf16[8,256], index: 4, kind: output, shape index: {}]  }
   0x1   :  { %10 = vsyncpa [#allocation6], 0 }
   0x2   :  { %12 = vsyncpa [#allocation6 + $0x1], 0 }
   0x3   :  { %13 = vsyncpa [#allocation4], 0 }
   0x4   :  { %15 = vsyncpa [#allocation4 + $0x1], 0  ;;  %s798_s15 = smov 0   ;;  %s800_s16 = smov 0  }
   0x5   :  { %s802_s17 = smov 0   ;;  %s804_s18 = smov 0  }
   0x6 LB: > { %s819_s19 = sadd.s32 4294967295, %s763_s18   ;;  %s518_s20 = sadd.s32 4294967294, %s763_s18   ;;  %s763_s18 = sphi %s804_s18, %s1001_s18   ;;  %s759_s17 = sphi %s802_s17, %s1000_s17   ;;  %s755_s16 = sphi %s800_s16, %s999_s16   ;;  %s751_s15 = sphi %s798_s15, %s998_s15  }
   0x7   : > { %s823_s21 = sadd.s32 1, %s763_s18   ;;  %s49_s22 = sadd.s32 1, %s759_s17 }
   0x8   : > { %s46_s23 = ssub.s32 %s763_s18, %s823_s21  ;;  %p56_p0 = scmp.ne.s32.totalorder %s759_s17, %s755_s16 }
   0x9   : > { %p47_p1 = scmp.eq.s32.totalorder %s46_s23, 0  ;;  %p57_p2 = scmp.eq.s32.totalorder %s763_s18, 0 }
   0xa   : > { %p62_p3 = scmp.ne.s32.totalorder %s755_s16, %s751_s15  ;;  %p979_p4 = scmp.eq.s32.totalorder %s819_s19, 0 }
   0xb   : > { %s835_s24 = scalar_select %p47_p1, %s759_s17, %s49_s22  }
   0xc   : > { %p837_p5 = por %p57_p2, %p56_p0  ;;  %p843_p6 = por %p979_p4, %p62_p3 }
   0xd   : > { %p138_p7 = scmp.eq.s32.totalorder %s819_s19, 1  ;;  %p144_p8 = scmp.eq.s32.totalorder %s518_s20, 1 }
   0xe   : > { %s984_s26 = scalar_select %p843_p6, 1, 0 }
   0xf   : > { %p519_p9 = scmp.ge.s32.totalorder %s763_s18, 1  ;;  %p151_p10 = scmp.lt.s32.totalorder %s763_s18, 3 }
  0x10   : > { %p850_p11 = por %p138_p7, %p56_p0  ;;  %p854_p12 = por %p144_p8, %p62_p3 }
  0x11   : > { %p858_p13 = pnand %p519_p9, %p151_p10  ;;  %s765_s30 = smov [#allocation2]  }
  0x12   : > { %s985_s27 = scalar_select %p850_p11, 1, 0 }
  0x13   : > { %s986_s28 = scalar_select %p854_p12, 1, 0 }
  0x14   : > { %s987_s29 = scalar_select %p858_p13, 1, 0 }
  0x15   : > { %p577_p2 = pneg %p858_p13  ;;  %s164_s5 = sshll.u32 %s765_s30, 4  ;;  %s165_s5 = int_to_ptr.vmem [resolvable:$true] %s164_s5 }
  0x16   : > { %p590_p4 = scmp.lt.s32.totalorder %s763_s18, 2  ;;  %p988_p0 = scmp.eq.s32.totalorder %s819_s19, 0 }
  0x17   : > { %s175_s7 = sand.u32 1, %s759_s17   ;;  %s652_s10 = scalar_lea.vmem %s165_s5, 64 }
  0x18   : > { %p868_p7 = pnand %p577_p2, %p988_p0  ;;  %p875_p3 = pnand %p590_p4, %p837_p5 }
  0x19   : > { %s522_s9 = sshll.u32 %s175_s7, 6  ;;  %p653_p9 = scmp.ne.s32.totalorder %s165_s5, %s652_s10 }
  0x1a   : > { %p643_p8 = pneg %p868_p7  ;;  %p660_p12 = scmp.lt.s32.totalorder %s165_s5, %s165_s5 }
  0x1b   : > { %p661_p11 = scmp.lt.s32.totalorder %s652_s10, %s652_s10 }
  0x1c   : > { %p655_p10 = pnand %p653_p9, %p643_p8 }
  0x1d   : > { %p662_p2 = por %p661_p11, %p660_p12 }
  0x1e   : > { %p656_p1 = pneg %p655_p10 }
  0x20   : > { %p663_p0 = pnand %p662_p2, %p656_p1 }
  0x22   : > { %666 = shalt.err (!%p663_p0)
}
  0x23   : > { %580 = dma.hbm_to_vmem [thread:$0]  (!%p868_p7), %s974_s0, 64, %s165_s5, [#allocation3]  }
  0x24   : > { %s523_s13 = sshll.u32 %s763_s18, 6  ;;  %s179_s14 = scalar_lea.vmem [#allocation5], %s522_s9 }
  0x25   : > { %s185_s20 = sshll.u32 %s179_s14, 4  ;;  %s890_s25 = scalar_lea.hbm %s975_s1, %s523_s13  ;;  %s892_s20 = int_to_ptr.vmem [resolvable:$true] %s185_s20 }
  0x26   : > { %s894_s30 = scalar_lea.sflag [#allocation6], %s175_s7  ;;  %s667_s6 = scalar_lea.hbm %s890_s25, 1024 }
  0x27   : > { %p668_p4 = scmp.ne.s32.totalorder %s890_s25, %s667_s6  ;;  %p669_p5 = pneg %p875_p3 }
  0x28   : > { %s672_s10 = scalar_lea.hbm %s975_s1, 2048  ;;  %p673_p1 = scmp.lt.s32.totalorder %s890_s25, %s975_s1 }
  0x29   : > { %p670_p11 = pnand %p669_p5, %p668_p4  ;;  %p674_p7 = scmp.lt.s32.totalorder %s672_s10, %s667_s6 }
  0x2b   : > { %p671_p12 = pneg %p670_p11  ;;  %p675_p8 = por %p674_p7, %p673_p1 }
  0x2d   : > { %p676_p9 = pnand %p675_p8, %p671_p12 }
  0x2f   : > { %679 = shalt.err (!%p676_p9)
}
  0x30   : > { %s680_s7 = scalar_lea.vmem %s892_s20, 1024  ;;  %s766_s13 = smov [#allocation5]  }
  0x31   : > { %p681_p10 = scmp.ne.s32.totalorder %s892_s20, %s680_s7  ;;  %s685_s14 = sshll.u32 %s766_s13, 4  ;;  %s686_s14 = int_to_ptr.vmem [resolvable:$false] %s685_s14 }
  0x32   : > { %s687_s22 = scalar_lea.vmem %s686_s14, 2048  ;;  %p688_p4 = scmp.lt.s32.totalorder %s892_s20, %s686_s14 }
  0x33   : > { %p683_p2 = pnand %p681_p10, %p669_p5  ;;  %p689_p11 = scmp.lt.s32.totalorder %s687_s22, %s680_s7 }
  0x35   : > { %p684_p0 = pneg %p683_p2  ;;  %p690_p6 = por %p689_p11, %p688_p4 }
  0x37   : > { %p691_p13 = pnand %p690_p6, %p684_p0 }
  0x39   : > { %694 = shalt.err (!%p691_p13)
}
  0x3a   : > { %s767_s23 = smov 128   ;;  %s768_s6 = smov 64  }
  0x3b   : > { %s769_s5 = smov 4   ;;  %p991_p5 = scmp.ne.s32.totalorder %s987_s29, 0 }
  0x3c   : > { %584 = dma.hbm_to_vmem [thread:$0]  (!%p875_p3), %s890_s25, 1024, %s892_s20, %s894_s30, %s767_s23, %s768_s6, %s769_s5  }
  0x3d   : > { %209 = sbr.rel (%p991_p5) target bundleno = 360 (0x168), region = 36  ;;  %p992_p12 = scmp.eq.s32.totalorder (!%p991_p5), %s819_s19, 0 }
  0x42   : > { %738 = dma.done.wait (%p992_p12), [#allocation3], 64   ;;  %p993_p1 = pmov %p992_p12 }
  0x43   : > { %s922_s9 = sand.u32 1, %s755_s16   ;;  %p994_p6 = scmp.ne.s32.totalorder %s984_s26, 0 }
  0x44   : > { %740 = vsyncadd (%p993_p1), [#allocation3], 4294967232  ;;  %s526_s10 = sshll.u32 %s922_s9, 6  ;;  %s216_s11 = scalar_lea.sflag [#allocation6], %s922_s9 }
  0x45   : > { %s219_s12 = scalar_lea.vmem [#allocation5], %s526_s10 }
  0x46   : > { %742 = dma.done.wait (%p994_p6), %s216_s11, 1024  }
  0x47   : > { %744 = vsyncadd (%p994_p6), %s216_s11, 4294966272  ;;  %v770_v0 = vmov 0.0   ;;  %vm771_vm0 = vmmov 0   ;;  %v631_v1 = vld [vmem:[%s219_s12 + $0x38] sm:$0xff]   ;;  %v632_v2 = vld [vmem:[%s219_s12 + $0x30] sm:$0xff]   ;;  %p250_p13 = scmp.lt.s32.totalorder %s819_s19, 1  ;;  %v388_v33 = vlaneseq }
  0x48   : > { %549 = vmatprep.subr.bf16.mxu0 %v770_v0  ;;  %565 = vmatprep.mubr.msk.bf16.mxu0 %vm771_vm0, %v770_v0  ;;  %v633_v3 = vld [vmem:[%s219_s12 + $0x28] sm:$0xff]   ;;  %v634_v4 = vld [vmem:[%s219_s12 + $0x20] sm:$0xff]   ;;  %v635_v5 = vld [vmem:[%s219_s12 + $0x18] sm:$0xff]   ;;  %s527_s13 = sshll.u32 %s922_s9, 2  ;;  %s537_s14 = sshll.u32 %s819_s19, 6 }
  0x49   : > { %550 = vmatpush3.bf16.msra.mxu0 %v631_v1  ;;  %v636_v6 = vld [vmem:[%s219_s12 + $0x10] sm:$0xff]   ;;  %v637_v7 = vld [vmem:[%s219_s12 + $0x8] sm:$0xff]   ;;  %v638_v8 = vld [vmem:[%s219_s12] sm:$0xff]   ;;  %s251_s26 = scalar_select %p250_p13, %s819_s19, 1  ;;  %v389_v34 = vshrl.u32 %v388_v33, 7 }
  0x4a   : > { %551 = vmatprep.subr.bf16.mxu0 %v770_v0  ;;  %v257_v9 = vld [vmem:[#allocation2] sm:$0xf]  ;;  %s249_s22 = scalar_lea.vmem [#allocation7], %s527_s13  ;;  %s416_s10 = scalar_lea.hbm %s978_s4, %s537_s14 }
  0x4b   : > { %s252_s20 = scalar_lea.vmem %s976_s2, %s251_s26  ;;  %s255_s7 = scalar_lea.vmem %s977_s3, %s251_s26  ;;  %v390_v36 = vsub.s32 0, %v389_v34 }
  0x4c   : > { %v382_v35 = vld [vmem:[%s252_s20] sm:$0x1]  ;;  %s418_s23 = sshll.u32 %s249_s22, 4  ;;  %s405_s11 = scalar_lea.sflag [#allocation4], %s922_s9  ;;  %s419_s23 = int_to_ptr.vmem [resolvable:$true] %s418_s23 }
  0x4d   : > { %552 = vmatpush3.bf16.msra.mxu0 %v632_v2  ;;  %v384_v39 = vld [vmem:[%s255_s7] sm:$0x1]  ;;  %s695_s12 = scalar_lea.vmem %s419_s23, 64  ;;  %p995_p7 = scmp.ne.s32.totalorder %s985_s27, 0 }
  0x4e   : > { %553 = vmatprep.subr.bf16.mxu0 %v770_v0  ;;  %p696_p3 = scmp.ne.s32.totalorder %s419_s23, %s695_s12  ;;  %s772_s26 = smov [#allocation7]  }
  0x4f   : > { %s699_s29 = sshll.u32 %s772_s26, 4  ;;  %s700_s29 = int_to_ptr.vmem [resolvable:$false] %s699_s29 }
  0x50   : > { %p697_p8 = pnand %p696_p3, %p995_p7  ;;  %s701_s19 = scalar_lea.vmem %s700_s29, 128 }
  0x51   : > { %554 = vmatpush3.bf16.msra.mxu0 %v633_v3  ;;  %p702_p10 = scmp.lt.s32.totalorder %s419_s23, %s700_s29  ;;  %p703_p2 = scmp.lt.s32.totalorder %s701_s19, %s695_s12 }
  0x52   : > { %555 = vmatprep.subr.bf16.mxu0 %v770_v0  ;;  %p698_p9 = pneg %p697_p8 }
  0x53   : > { %p704_p0 = por %p703_p2, %p702_p10 }
  0x55   : > { %556 = vmatpush3.bf16.msra.mxu0 %v634_v4  ;;  %p705_p4 = pnand %p704_p0, %p698_p9 }
  0x56   : > { %557 = vmatprep.subr.bf16.mxu0 %v770_v0 }
  0x59   : > { %558 = vmatpush3.bf16.msra.mxu0 %v635_v5 }
  0x5a   : > { %559 = vmatprep.subr.bf16.mxu0 %v770_v0 }
  0x5d   : > { %560 = vmatpush3.bf16.msra.mxu0 %v636_v6 }
  0x5e   : > { %561 = vmatprep.subr.bf16.mxu0 %v770_v0 }
  0x61   : > { %562 = vmatpush3.bf16.msra.mxu0 %v637_v7 }
  0x62   : > { %563 = vmatprep.subr.bf16.mxu0 %v770_v0 }
  0x65   : > { %564 = vmatpush3.bf16.msra.mxu0 %v638_v8 }
  0x68   : > { %566 = vmatmul.mubr.bf16.vlgmr.msra.gmra.mxu0 %v257_v9 }
 0x128   : > { %v356_v10 = vpop.f32.mrf.mxu0 }
 0x129   : > { %v362_v11 = vrot.slane %v356_v10, 4  ;;  %v368_v12 = vmul.f32 %v356_v10, %v356_v10 }
 0x12a   : > { %v567_v13 = vpop.f32.mrf.mxu0 }
 0x12b   : > { %v363_v14 = vadd.f32 %v362_v11, %v356_v10  ;;  %v369_v15 = vrot.slane %v368_v12, 4 }
 0x12c   : > { %v359_v16 = vpop.f32.mrf.mxu0 }
 0x12d   : > { %v364_v17 = vrot.slane %v363_v14, 2  ;;  %v370_v18 = vadd.f32 %v369_v15, %v368_v12 }
 0x12e   : > { %v568_v19 = vpop.f32.mrf.mxu0 }
 0x12f   : > { %v365_v20 = vadd.f32 %v364_v17, %v363_v14  ;;  %v371_v21 = vrot.slane %v370_v18, 2 }
 0x131   : > { %v366_v22 = vrot.slane %v365_v20, 1  ;;  %v372_v23 = vadd.f32 %v371_v21, %v370_v18 }
 0x133   : > { %v367_v24 = vadd.f32 %v366_v22, %v365_v20  ;;  %v373_v25 = vrot.slane %v372_v23, 1 }
 0x135   : > { %v374_v26 = vadd.f32 %v373_v25, %v372_v23  ;;  %v375_v27 = vmul.f32 0.125, %v367_v24 }
 0x137   : > { %v376_v28 = vmul.f32 0.125, %v374_v26  ;;  %v377_v29 = vmul.f32 %v375_v27, %v375_v27 }
 0x139   : > { %v378_v30 = vsub.f32 %v376_v28, %v377_v29 }
 0x13b   : > { %v379_v31 = vmax.f32 %v378_v30, 0.0 }
 0x13d   : > { %v380_v32 = vadd.f32 1e-05, %v379_v31 }
 0x13f   : > { %639 = vrsqrt.f32 %v380_v32 }
 0x14c   : > { %v640_v37 = vpop.eup %639 }
 0x14d   : > { %v383_v38 = vmul.f32 %v640_v37, %v382_v35 }
 0x14f   : > { %v385_v40 = vmul.f32 %v383_v38, %v375_v27  ;;  %v391_v41 = vrot.slane %v383_v38, %v390_v36 }
 0x151   : > { %v386_v42 = vsub.f32 %v384_v39, %v385_v40  ;;  %v393_v43 = vmul.f32 %v391_v41, %v356_v10 }
 0x153   : > { %v398_v44 = vrot.slane %v386_v42, %v390_v36 }
 0x155   : > { %v400_v45 = vadd.f32 %v398_v44, %v393_v43 }
 0x157   : > { %v401_v46 = vmax.f32 %v400_v45, 0.0 }
 0x159   : > { %v402_v47 = vpack.c.bf16 %v401_v46, %v401_v46 }
 0x15b   : > { %403 = vst [vmem:[%s249_s22] sm:$0xf] %v402_v47 }
 0x15c   : > { %708 = shalt.err (!%p705_p4)
}
 0x15d   : > { %s709_s8 = scalar_lea.hbm %s416_s10, 64  ;;  %s713_s25 = scalar_lea.hbm %s978_s4, 128 }
 0x15e   : > { %p710_p11 = scmp.ne.s32.totalorder %s416_s10, %s709_s8  ;;  %p714_p1 = scmp.lt.s32.totalorder %s416_s10, %s978_s4 }
 0x15f   : > { %p715_p6 = scmp.lt.s32.totalorder %s713_s25, %s709_s8 }
 0x160   : > { %p711_p5 = pnand %p710_p11, %p995_p7 }
 0x161   : > { %p716_p13 = por %p715_p6, %p714_p1 }
 0x162   : > { %p712_p12 = pneg %p711_p5 }
 0x164   : > { %p717_p3 = pnand %p716_p13, %p712_p12 }
 0x166   : > { %720 = shalt.err (!%p717_p3)
}
 0x167   : > { %575 = dma.vmem_to_hbm [thread:$0]  (%p995_p7), %s419_s23, 64, %s416_s10, %s405_s11  }
 0x168 PF: > { %s430_s13 = sand.u32 1, %s751_s15   ;;  %p996_p8 = scmp.ne.s32.totalorder %s986_s28, 0 }
 0x169   : > { %p997_p9 = scmp.ge.s32.totalorder %s763_s18, 2  ;;  %s431_s14 = scalar_lea.sflag [#allocation4], %s430_s13 }
 0x16b   : > { %p586_p10 = pnand %p997_p9, %p996_p8 }
 0x16d   : > { %p587_p2 = pneg %p586_p10 }
 0x16f   : > { %746 = dma.done.wait (%p587_p2), %s431_s14, 64  }
 0x170   : > { %748 = vsyncadd (%p587_p2), %s431_s14, 4294967232  ;;  %p18_p0 = scmp.ge.s32.totalorder %s823_s21, 4   ;;  %s998_s15 = smov %s755_s16 }
 0x171   : > { %s999_s16 = smov %s759_s17  ;;  %s1000_s17 = smov %s835_s24 }
 0x172   : > { %s1001_s18 = smov %s823_s21  ;;  %20 = sbr.rel (!%p18_p0) target bundleno = 6 (0x6), region = 92 }
 0x177   :  { %436 = vsyncpa [#allocation3], 1 }
 0x178   :  { %438 = vsyncpa [#allocation3 + $0x1], 1 }
 0x179   :  { %439 = vsyncpa [#allocation6], 1 }
 0x17a   :  { %441 = vsyncpa [#allocation6 + $0x1], 1 }
 0x17b   :  { %442 = vsyncpa [#allocation4], 1 }
 0x17c   :  { %444 = vsyncpa [#allocation4 + $0x1], 1 }

</bundles_post_ra>
